<compile_context>
chip_gen: v6e
topology: v6e:2x2x1
jax: 0.10.0
libtpu: 0.0.40
codegen_flags: <defaults>
</compile_context>

<pallas_src>
import numpy as np
import jax
import jax.numpy as jnp
from jax.experimental import pallas as pl
from jax.experimental.pallas import tpu as pltpu


def _resize_matrix(in_size: int, out_size: int, antialias: bool = True) -> np.ndarray:
    """Dense 1-D bilinear (triangle-filter) interpolation matrix, PIL/torchvision style."""
    scale = in_size / out_size
    kscale = max(scale, 1.0) if antialias else 1.0
    support = kscale  # triangle filter support 1, widened by kscale
    M = np.zeros((out_size, in_size), dtype=np.float64)
    for i in range(out_size):
        center = (i + 0.5) * scale
        lo = int(np.floor(center - support - 0.5))
        hi = int(np.ceil(center + support + 0.5))
        js = np.arange(lo, hi + 1)
        w = np.maximum(0.0, 1.0 - np.abs((js + 0.5 - center) / kscale))
        ssum = w.sum()
        if ssum <= 0.0:
            continue
        w = w / ssum
        jc = np.clip(js, 0, in_size - 1)
        for j, wj in zip(jc, w):
            M[i, j] += wj
    return M.astype(np.float32)


def make_rgb_transform(
    in_hw: tuple[int, int],
    resize: tuple[int, int],
    crop: tuple[int, int],
    imagenet_norm: bool = True,
    channels: int = 3,
):
    """Returns fn(x: [N, C, H, W]) -> f32[N, C, CH, CW]."""
    H, W = in_hw
    RH, RW = resize
    CH, CW = crop
    C = channels
    # torchvision CenterCrop with crop > resize pads; not supported here.
    assert CH <= RH and CW <= RW, "crop size must not exceed resize size"
    top = int(round((RH - CH) / 2.0))
    left = int(round((RW - CW) / 2.0))

    # Interpolation matrices with the center-crop folded in host-side.
    A_crop = _resize_matrix(H, RH)[top:top + CH, :]      # (CH, H)
    B_crop = _resize_matrix(W, RW)[left:left + CW, :]    # (CW, W)
    B_T = jnp.asarray(np.ascontiguousarray(B_crop.T))    # (W, CW) pre-transposed

    if imagenet_norm:
        assert C == 3
        mean = np.asarray([0.485, 0.456, 0.406], dtype=np.float32)
        std = np.asarray([0.229, 0.224, 0.225], dtype=np.float32)
    else:
        mean = np.zeros((C,), dtype=np.float32)
        std = np.ones((C,), dtype=np.float32)
    inv_std = (1.0 / std).astype(np.float32)

    # Fold the per-channel 1/std into the row-interpolation matrices and keep
    # -mean/std as a broadcastable bias -> normalization is free in the epilogue.
    A_scaled = jnp.asarray(A_crop[None, :, :] * inv_std[:, None, None])  # (C, CH, H)
    bias = jnp.asarray((-mean * inv_std).reshape(C, 1, 1).astype(np.float32))

    def kernel(x_ref, a_ref, bt_ref, bias_ref, o_ref):
        # x_ref block: (1, C, H, W) in its native dtype; cast after the VMEM load.
        x = x_ref[0].astype(jnp.float32)                         # (C, H, W)
        # Row resize + crop rows + per-channel 1/std, batched over channels.
        z = jnp.einsum("cph,chw->cpw", a_ref[...], x,
                       preferred_element_type=jnp.float32)        # (C, CH, W)
        # Column resize + crop cols as ONE (C*CH, W) @ (W, CW) MXU matmul.
        y = jnp.dot(z.reshape(C * CH, W), bt_ref[...],
                    preferred_element_type=jnp.float32)           # (C*CH, CW)
        # Add -mean/std (broadcast over sublane/lane).
        o_ref[0] = y.reshape(C, CH, CW) + bias_ref[...]

    flops_per_image = 2 * (C * CH * H * W + C * CH * W * CW)

    def fn(x: jax.Array) -> jax.Array:
        N, c, h, w = x.shape
        assert (c, h, w) == (C, H, W)
        bytes_accessed = (
            x.size * x.dtype.itemsize            # input read
            + N * C * CH * CW * 4                # output write
            + (A_scaled.size + B_T.size + bias.size) * 4
        )
        return pl.pallas_call(
            kernel,
            out_shape=jax.ShapeDtypeStruct((N, C, CH, CW), jnp.float32),
            grid=(N,),
            in_specs=[
                pl.BlockSpec((1, C, H, W), lambda n: (n, 0, 0, 0)),   # image n, native dtype
                pl.BlockSpec((C, CH, H), lambda n: (0, 0, 0)),        # A_scaled (resident)
                pl.BlockSpec((W, CW), lambda n: (0, 0)),              # B^T (resident)
                pl.BlockSpec((C, 1, 1), lambda n: (0, 0, 0)),         # bias (resident)
            ],
            out_specs=pl.BlockSpec((1, C, CH, CW), lambda n: (n, 0, 0, 0)),
            compiler_params=pltpu.CompilerParams(
                dimension_semantics=("parallel",),
            ),
            cost_estimate=pl.CostEstimate(
                flops=N * flops_per_image,
                transcendentals=0,
                bytes_accessed=bytes_accessed,
            ),
        )(x, A_scaled, B_T, bias)

    return fn


def _reference(x, in_hw, resize, crop, imagenet_norm=True):
    """Pure-JAX reference of the same transform (resize -> center crop -> normalize)."""
    H, W = in_hw
    RH, RW = resize
    CH, CW = crop
    top = int(round((RH - CH) / 2.0))
    left = int(round((RW - CW) / 2.0))
    A = jnp.asarray(_resize_matrix(H, RH))
    B = jnp.asarray(_resize_matrix(W, RW))
    xf = x.astype(jnp.float32)
    r = jnp.einsum("ph,nchw->ncpw", A, xf)
    r = jnp.einsum("qw,ncpw->ncpq", B, r)
    r = r[:, :, top:top + CH, left:left + CW]
    if imagenet_norm:
        mean = jnp.asarray([0.485, 0.456, 0.406]).reshape(1, 3, 1, 1)
        std = jnp.asarray([0.229, 0.224, 0.225]).reshape(1, 3, 1, 1)
        r = (r - mean) / std
    return r


if __name__ == "__main__":
    key = jax.random.PRNGKey(0)
    N, C, H, W = 2, 3, 32, 32          # small RGB images, NCHW
    RESIZE = (24, 24)
    CROP = (16, 16)

    # rgb_dict with a single camera key, as the module consumes a dict
    rgb_dict = {"rgb": jax.random.uniform(key, (N, C, H, W), dtype=jnp.float32)}

    transform = make_rgb_transform((H, W), RESIZE, CROP, imagenet_norm=True, channels=C)
    out_dict = {k: transform(v) for k, v in rgb_dict.items()}
    out = jax.block_until_ready(out_dict["rgb"])

    ref = _reference(rgb_dict["rgb"], (H, W), RESIZE, CROP, imagenet_norm=True)
    np.testing.assert_allclose(np.asarray(out), np.asarray(ref), atol=1e-5, rtol=1e-5)
    assert out.shape == (N, C, CROP[0], CROP[1])
    print("KERNEL_OK")
</pallas_src>

<mosaic_0001>
module attributes {stable_mosaic.version = 11 : i64} {
  func.func @kernel(%arg0: i32, %arg1: memref<1x3x32x32xf32, #tpu.memory_space<vmem>>, %arg2: memref<3x16x32xf32, #tpu.memory_space<vmem>>, %arg3: memref<32x16xf32, #tpu.memory_space<vmem>>, %arg4: memref<3x1x1xf32, #tpu.memory_space<vmem>>, %arg5: memref<1x3x16x16xf32, #tpu.memory_space<vmem>>) attributes {dimension_semantics = [#tpu.dimension_semantics<parallel>], iteration_bounds = array<i64: 2>, scalar_prefetch = 0 : i64, scratch_operands = 0 : i64, tpu.core_type = #tpu.core_type<tc>, window_params = [{transform_indices = @transform_0, window_bounds = array<i64: 1, 3, 32, 32>}, {pipeline_mode = #tpu.pipeline_mode<synchronous>, transform_indices = @transform_1, window_bounds = array<i64: 3, 16, 32>}, {pipeline_mode = #tpu.pipeline_mode<synchronous>, transform_indices = @transform_2, window_bounds = array<i64: 32, 16>}, {pipeline_mode = #tpu.pipeline_mode<synchronous>, transform_indices = @transform_3, window_bounds = array<i64: 3, 1, 1>}, {transform_indices = @transform_4, window_bounds = array<i64: 1, 3, 16, 16>}]} {
    %c0 = arith.constant 0 : index
    %c0_0 = arith.constant 0 : index
    %c0_1 = arith.constant 0 : index
    %c0_2 = arith.constant 0 : index
    %0 = vector.load %arg1[%c0, %c0_0, %c0_1, %c0_2] : memref<1x3x32x32xf32, #tpu.memory_space<vmem>>, vector<1x3x32x32xf32>
    %1 = vector.shape_cast %0 : vector<1x3x32x32xf32> to vector<3x32x32xf32>
    %c0_3 = arith.constant 0 : index
    %c0_4 = arith.constant 0 : index
    %c0_5 = arith.constant 0 : index
    %2 = vector.load %arg2[%c0_3, %c0_4, %c0_5] : memref<3x16x32xf32, #tpu.memory_space<vmem>>, vector<3x16x32xf32>
    "tpu.trace_start"() <{level = 10 : i32, message = "cph,chw->cpw"}> : () -> ()
    %cst = arith.constant dense<0.000000e+00> : vector<3x16x32xf32>
    %3 = tpu.matmul %2, %1, %cst {dimension_numbers = #tpu.dot_dimension_numbers<[2], [1], [1], [2], [0, 0, 0, 1, 1, 2], [0], [0]>} : vector<3x16x32xf32>, vector<3x32x32xf32>, vector<3x16x32xf32> -> vector<3x16x32xf32>
    "tpu.trace_stop"() : () -> ()
    %4 = vector.shape_cast %3 : vector<3x16x32xf32> to vector<48x32xf32>
    %c0_6 = arith.constant 0 : index
    %c0_7 = arith.constant 0 : index
    %5 = vector.load %arg3[%c0_6, %c0_7] : memref<32x16xf32, #tpu.memory_space<vmem>>, vector<32x16xf32>
    %cst_8 = arith.constant dense<0.000000e+00> : vector<48x16xf32>
    %6 = tpu.matmul %4, %5, %cst_8 {dimension_numbers = #tpu.dot_dimension_numbers<[1], [0], [0], [1], [0, 0, 1, 1], [], []>} : vector<48x32xf32>, vector<32x16xf32>, vector<48x16xf32> -> vector<48x16xf32>
    %7 = vector.shape_cast %6 : vector<48x16xf32> to vector<3x16x16xf32>
    %c0_9 = arith.constant 0 : index
    %c0_10 = arith.constant 0 : index
    %c0_11 = arith.constant 0 : index
    %8 = vector.load %arg4[%c0_9, %c0_10, %c0_11] : memref<3x1x1xf32, #tpu.memory_space<vmem>>, vector<3x1x1xf32>
    %9 = vector.broadcast %8 : vector<3x1x1xf32> to vector<3x16x16xf32>
    %10 = arith.addf %7, %9 : vector<3x16x16xf32>
    %c0_12 = arith.constant 0 : index
    %c0_13 = arith.constant 0 : index
    %c0_14 = arith.constant 0 : index
    %c0_15 = arith.constant 0 : index
    %11 = vector.load %arg5[%c0_12, %c0_13, %c0_14, %c0_15] : memref<1x3x16x16xf32, #tpu.memory_space<vmem>>, vector<1x3x16x16xf32>
    %12 = vector.shape_cast %11 : vector<1x3x16x16xf32> to vector<3x16x16xf32>
    %13 = vector.shape_cast %10 : vector<3x16x16xf32> to vector<1x3x16x16xf32>
    tpu.vector_store %arg5[%c0_12, %c0_13, %c0_14, %c0_15], %13 {strides = array<i32>} : memref<1x3x16x16xf32, #tpu.memory_space<vmem>>, vector<1x3x16x16xf32>,
    return
  }
  func.func @transform_0(%arg0: i32) -> (i32, i32, i32, i32) {
    %c0_i32 = arith.constant 0 : i32
    %c0_i32_0 = arith.constant 0 : i32
    %c0_i32_1 = arith.constant 0 : i32
    %c0_i32_2 = arith.constant 0 : i32
    return %arg0, %c0_i32, %c0_i32_0, %c0_i32_1 : i32, i32, i32, i32
  }
  func.func @transform_1(%arg0: i32) -> (i32, i32, i32) {
    %c0_i32 = arith.constant 0 : i32
    %c0_i32_0 = arith.constant 0 : i32
    %c0_i32_1 = arith.constant 0 : i32
    %c0_i32_2 = arith.constant 0 : i32
    return %c0_i32, %c0_i32_0, %c0_i32_1 : i32, i32, i32
  }
  func.func @transform_2(%arg0: i32) -> (i32, i32) {
    %c0_i32 = arith.constant 0 : i32
    %c0_i32_0 = arith.constant 0 : i32
    %c0_i32_1 = arith.constant 0 : i32
    return %c0_i32, %c0_i32_0 : i32, i32
  }
  func.func @transform_3(%arg0: i32) -> (i32, i32, i32) {
    %c0_i32 = arith.constant 0 : i32
    %c0_i32_0 = arith.constant 0 : i32
    %c0_i32_1 = arith.constant 0 : i32
    %c0_i32_2 = arith.constant 0 : i32
    return %c0_i32, %c0_i32_0, %c0_i32_1 : i32, i32, i32
  }
  func.func @transform_4(%arg0: i32) -> (i32, i32, i32, i32) {
    %c0_i32 = arith.constant 0 : i32
    %c0_i32_0 = arith.constant 0 : i32
    %c0_i32_1 = arith.constant 0 : i32
    %c0_i32_2 = arith.constant 0 : i32
    return %arg0, %c0_i32, %c0_i32_0, %c0_i32_1 : i32, i32, i32, i32
  }
}

</mosaic_0001>

<bundles_post_ra>
// kernel: tpu_custom_call.1
= control target key start
LH: loop header
LB: loop body
LE: loop exit
PB: predicated region body
PF: predicated region fallthrough
CT: control target
= control target key end

     0   :  { %9 = vsyncpa [#allocation3], 0  ;;  %s1230_s0 = inlined_call_operand.hbm [shape: f32[2,3,32,32], index: 0, kind: input, shape index: {}]   ;;  %s1231_s1 = inlined_call_operand.vmem [shape: f32[3,16,32], index: 1, kind: input, shape index: {}]   ;;  %s1232_s2 = inlined_call_operand.vmem [shape: f32[32,16], index: 2, kind: input, shape index: {}]   ;;  %s1233_s3 = inlined_call_operand.vmem [shape: f32[3,1,1], index: 3, kind: input, shape index: {}]   ;;  %s1234_s4 = inlined_call_operand.hbm [shape: f32[2,3,16,16], index: 4, kind: output, shape index: {}]  }
   0x1   :  { %11 = vsyncpa [#allocation3 + $0x1], 0 }
   0x2   :  { %12 = vsyncpa [#allocation4], 0 }
   0x3   :  { %14 = vsyncpa [#allocation4 + $0x1], 0  ;;  %s1010_s15 = smov 0   ;;  %s1012_s16 = smov 0  }
   0x4   :  { %s1014_s17 = smov 0   ;;  %s1016_s18 = smov 0  }
   0x5 LB: > { %s1031_s19 = sadd.s32 4294967295, %s976_s18   ;;  %s725_s20 = sadd.s32 4294967294, %s976_s18   ;;  %s976_s18 = sphi %s1016_s18, %s1248_s18   ;;  %s972_s17 = sphi %s1014_s17, %s1247_s17   ;;  %s968_s16 = sphi %s1012_s16, %s1246_s16   ;;  %s964_s15 = sphi %s1010_s15, %s1245_s15  }
   0x6   : > { %s1035_s21 = sadd.s32 1, %s976_s18   ;;  %s27_s22 = sadd.s32 1, %s972_s17 }
   0x7   : > { %s24_s23 = ssub.s32 %s976_s18, %s1035_s21  ;;  %p34_p0 = scmp.ne.s32.totalorder %s972_s17, %s968_s16 }
   0x8   : > { %p25_p1 = scmp.eq.s32.totalorder %s24_s23, 0  ;;  %p35_p2 = scmp.eq.s32.totalorder %s976_s18, 0 }
   0x9   : > { %p40_p3 = scmp.ne.s32.totalorder %s968_s16, %s964_s15  ;;  %p41_p4 = scmp.eq.s32.totalorder %s1031_s19, 0 }
   0xa   : > { %s1047_s24 = scalar_select %p25_p1, %s972_s17, %s27_s22  }
   0xb   : > { %p36_p5 = por %p35_p2, %p34_p0  ;;  %p1049_p6 = por %p41_p4, %p40_p3 }
   0xc   : > { %p127_p7 = scmp.eq.s32.totalorder %s1031_s19, 1  ;;  %p133_p8 = scmp.eq.s32.totalorder %s725_s20, 1 }
   0xd   : > { %s1237_s25 = scalar_select %p1049_p6, 1, 0 }
   0xe   : > { %p843_p10 = scmp.lt.s32.totalorder %s976_s18, 2  ;;  %p1056_p11 = por %p127_p7, %p34_p0 }
   0xf   : > { %p1060_p12 = por %p133_p8, %p40_p3  ;;  %s162_s28 = sand.u32 1, %s972_s17  }
  0x10   : > { %s1238_s26 = scalar_select %p1056_p11, 1, 0 }
  0x11   : > { %s1239_s27 = scalar_select %p1060_p12, 1, 0 }
  0x12   : > { %s827_s29 = smul.u32 1536, %s976_s18  ;;  %p1071_p13 = pnand %p843_p10, %p36_p5 }
  0x13   : > { %s826_s30 = smul.u32 96, %s162_s28  ;;  %s1077_s11 = scalar_lea.sflag [#allocation3], %s162_s28 }
  0x14   : > { %s1069_s7 = scalar_lea.hbm %s1230_s0, %s827_s29  ;;  %p886_p1 = pneg %p1071_p13 }
  0x15   : > { %s166_s9 = scalar_lea.vmem [#allocation2], %s826_s30  ;;  %s884_s12 = scalar_lea.hbm %s1069_s7, 1536 }
  0x16   : > { %s173_s10 = sshll.u32 %s166_s9, 4  ;;  %p885_p0 = scmp.ne.s32.totalorder %s1069_s7, %s884_s12  ;;  %s1075_s10 = int_to_ptr.vmem [resolvable:$true] %s173_s10 }
  0x17   : > { %s889_s20 = scalar_lea.hbm %s1230_s0, 3072  ;;  %p890_p4 = scmp.lt.s32.totalorder %s1069_s7, %s1230_s0 }
  0x18   : > { %p887_p2 = pnand %p886_p1, %p885_p0  ;;  %p891_p5 = scmp.lt.s32.totalorder %s889_s20, %s884_s12 }
  0x1a   : > { %p888_p3 = pneg %p887_p2  ;;  %p892_p7 = por %p891_p5, %p890_p4 }
  0x1c   : > { %p893_p8 = pnand %p892_p7, %p888_p3 }
  0x1e   : > { %896 = shalt.err (!%p893_p8)
}
  0x1f   : > { %s897_s28 = scalar_lea.vmem %s1075_s10, 1536  ;;  %s978_s29 = smov [#allocation2]  }
  0x20   : > { %p898_p10 = scmp.ne.s32.totalorder %s1075_s10, %s897_s28  ;;  %s902_s30 = sshll.u32 %s978_s29, 4  ;;  %s903_s30 = int_to_ptr.vmem [resolvable:$false] %s902_s30 }
  0x21   : > { %s904_s5 = scalar_lea.vmem %s903_s30, 3072  ;;  %p905_p2 = scmp.lt.s32.totalorder %s1075_s10, %s903_s30 }
  0x22   : > { %p900_p9 = pnand %p898_p10, %p886_p1  ;;  %p906_p12 = scmp.lt.s32.totalorder %s904_s5, %s897_s28 }
  0x24   : > { %p901_p0 = pneg %p900_p9  ;;  %p907_p11 = por %p906_p12, %p905_p2 }
  0x26   : > { %p908_p6 = pnand %p907_p11, %p901_p0 }
  0x28   : > { %911 = shalt.err (!%p908_p6)
}
  0x29   : > { %s979_s6 = smov 128   ;;  %s980_s9 = smov 8  }
  0x2a   : > { %838 = dma.hbm_to_vmem [thread:$0]  (!%p1071_p13), %s1069_s7, 1536, %s1075_s10, %s1077_s11, %s979_s6, %s979_s6, %s980_s9  }
  0x2b   : > { %p729_p9 = scmp.ge.s32.totalorder %s976_s18, 1  ;;  %p181_p1 = scmp.lt.s32.totalorder %s976_s18, 3 }
  0x2d   : > { %p182_p3 = pnand %p729_p9, %p181_p1 }
  0x2e   : > { %s1101_s12 = sand.u32 (!%p182_p3), 1, %s968_s16   ;;  %p1241_p6 = scmp.ne.s32.totalorder (!%p182_p3), %s1237_s25, 0 }
  0x2f   : > { %185 = sbr.rel (%p182_p3) target bundleno = 478 (0x1de), region = 36  ;;  %s188_s14 = scalar_lea.sflag (!%p182_p3), [#allocation3], %s1101_s12 }
  0x30   : > { %s828_s13 = smul.u32 (!%p182_p3), 96, %s1101_s12 }
  0x32   : > { %s1105_s20 = scalar_lea.vmem (!%p182_p3), [#allocation2], %s828_s13 }
  0x34   : > { %955 = dma.done.wait (%p1241_p6), %s188_s14, 1536  }
  0x35   : > { %957 = vsyncadd (%p1241_p6), %s188_s14, 4294965760  ;;  %v219_v0 = vld [vmem:[%s1105_s20 + $0x18] sm:$0xff]  ;;  %v218_v1 = vld [vmem:[%s1105_s20 + $0x10] sm:$0xff]  ;;  %vm234_vm0 = vcmask 261120   ;;  %v981_v23 = vmov 0   ;;  %s829_s5 = smul.u32 48, %s1101_s12 }
  0x36   : > { %v223_v2 = vld [vmem:[%s1105_s20 + $0x38] sm:$0xff]  ;;  %776 = vmatprep.subr.mxu0 %v219_v0  ;;  %v222_v3 = vld [vmem:[%s1105_s20 + $0x30] sm:$0xff]  ;;  %v217_v4 = vld [vmem:[%s1105_s20 + $0x8] sm:$0xff]  ;;  %882 = vset.pattern.permute.xlu0 %v981_v23  ;;  %vm631_vm1 = vcmask 130048   ;;  %s830_s13 = smul.u32 768, %s1031_s19  ;;  %s639_s19 = scalar_lea.sflag [#allocation4], %s1101_s12 }
  0x37   : > { %787 = vmatprep.subr.mxu1 %v223_v2  ;;  %777 = vmatpush3.msra.mxu0 %v219_v0  ;;  %v221_v5 = vld [vmem:[%s1105_s20 + $0x28] sm:$0xff]  ;;  %v228_v6 = vld [vmem:[%s1231_s1] sm:$0xff]  ;;  %v227_v10 = vld [vmem:[%s1105_s20 + $0x58] sm:$0xff]  ;;  %s215_s6 = scalar_lea.vmem [#allocation5], %s829_s5  ;;  %p1242_p12 = scmp.ne.s32.totalorder %s1238_s26, 0 }
  0x38   : > { %788 = vmatpush3.msra.mxu1 %v223_v2  ;;  %778 = vmatprep.subr.mxu0 %v218_v1  ;;  %v216_v7 = vld [vmem:[%s1105_s20] sm:$0xff]  ;;  %v229_v9 = vld [vmem:[%s1231_s1 + $0x8] sm:$0xff]  ;;  %v230_v11 = vld [vmem:[%s1231_s1 + $0x10] sm:$0xff]  ;;  %s652_s9 = sshll.u32 %s215_s6, 4  ;;  %s1185_s7 = scalar_lea.hbm %s1234_s4, %s830_s13  ;;  %s1180_s9 = int_to_ptr.vmem [resolvable:$true] %s652_s9 }
  0x39   : > { %789 = vmatprep.subr.mxu1 %v222_v3  ;;  %779 = vmatpush3.msra.mxu0 %v218_v1  ;;  %v220_v8 = vld [vmem:[%s1105_s20 + $0x20] sm:$0xff]  ;;  %v231_v12 = vld [vmem:[%s1231_s1 + $0x18] sm:$0xff]  ;;  %v226_v13 = vld [vmem:[%s1105_s20 + $0x50] sm:$0xff]  ;;  %s912_s8 = scalar_lea.vmem %s1180_s9, 768 }
  0x3a   : > { %790 = vmatpush3.msra.mxu1 %v222_v3  ;;  %780 = vmatprep.subr.mxu0 %v217_v4  ;;  %v232_v14 = vld [vmem:[%s1231_s1 + $0x20] sm:$0xff]  ;;  %v481_v15 = vld [vmem:[%s1232_s2 + $0x18] sm:$0xff]  ;;  %v225_v16 = vld [vmem:[%s1105_s20 + $0x48] sm:$0xff]  ;;  %p913_p11 = scmp.ne.s32.totalorder %s1180_s9, %s912_s8 }
  0x3b   : > { %791 = vmatprep.subr.mxu1 %v221_v5  ;;  %781 = vmatpush3.msra.mxu0 %v217_v4  ;;  %v480_v17 = vld [vmem:[%s1232_s2 + $0x10] sm:$0xff]  ;;  %v224_v18 = vld [vmem:[%s1105_s20 + $0x40] sm:$0xff]  ;;  %v233_v19 = vld [vmem:[%s1231_s1 + $0x28] sm:$0xff]  ;;  %s982_s20 = smov [#allocation5]  }
  0x3c   : > { %784 = vmatprep.mubr.msk.f32.mxu0 %vm234_vm0, %v228_v6  ;;  %782 = vmatprep.subr.mxu0 %v216_v7  ;;  %v479_v20 = vld [vmem:[%s1232_s2 + $0x8] sm:$0xff]  ;;  %v478_v21 = vld [vmem:[%s1232_s2] sm:$0xff]  ;;  %p914_p13 = pnand %p913_p11, %p1242_p12  ;;  %s916_s10 = sshll.u32 %s982_s20, 4  ;;  %s917_s10 = int_to_ptr.vmem [resolvable:$false] %s916_s10 }
  0x3d   : > { %792 = vmatpush3.msra.mxu1 %v221_v5  ;;  %783 = vmatpush3.msra.mxu0 %v216_v7  ;;  %v742_v22 = vld [vmem:[%s1233_s3] ss:$0 sm:$0xff]  ;;  %v744_v24 = vld [vmem:[%s1233_s3 + $0x2] ss:$0 sm:$0xff]  ;;  %v743_v25 = vld [vmem:[%s1233_s3 + $0x1] ss:$0 sm:$0xff]  ;;  %p919_p5 = scmp.lt.s32.totalorder %s1180_s9, %s917_s10 }
  0x3e   : > { %793 = vmatprep.subr.mxu1 %v220_v8  ;;  %785 = vmatmul.mubr.msk.f32.vlgmr.msra.gmra.mxu0 %vm234_vm0, %v229_v9  ;;  %p915_p4 = pneg %p914_p13  ;;  %s918_s11 = scalar_lea.vmem %s917_s10, 1536 }
  0x3f   : > { %798 = vmatprep.subr.mxu0 %v227_v10  ;;  %794 = vmatpush3.msra.mxu1 %v220_v8  ;;  %p920_p7 = scmp.lt.s32.totalorder %s918_s11, %s912_s8 }
  0x40   : > { %795 = vmatprep.mubr.msk.f32.mxu1 %vm234_vm0, %v230_v11  ;;  %799 = vmatpush3.msra.mxu0 %v227_v10 }
  0x41   : > { %796 = vmatmul.mubr.msk.f32.vlgmr.msra.gmra.mxu1 %vm234_vm0, %v231_v12  ;;  %800 = vmatprep.subr.mxu0 %v226_v13  ;;  %p921_p8 = por %p920_p7, %p919_p5 }
  0x42   : > { %806 = vmatprep.mubr.msk.f32.mxu0 %vm234_vm0, %v232_v14  ;;  %801 = vmatpush3.msra.mxu0 %v226_v13 }
  0x43   : > { %809 = vmatprep.subr.mxu1 %v481_v15  ;;  %802 = vmatprep.subr.mxu0 %v225_v16  ;;  %p922_p10 = pnand %p921_p8, %p915_p4 }
  0x44   : > { %810 = vmatpush3.msra.mxu1 %v481_v15  ;;  %803 = vmatpush3.msra.mxu0 %v225_v16 }
  0x45   : > { %811 = vmatprep.subr.mxu1 %v480_v17  ;;  %804 = vmatprep.subr.mxu0 %v224_v18 }
  0x46   : > { %812 = vmatpush3.msra.mxu1 %v480_v17  ;;  %805 = vmatpush3.msra.mxu0 %v224_v18 }
  0x47   : > { %807 = vmatmul.mubr.msk.f32.vlgmr.msra.gmra.mxu0 %vm234_vm0, %v233_v19  ;;  %813 = vmatprep.subr.mxu1 %v479_v20 }
  0x48   : > { %814 = vmatpush3.msra.mxu1 %v479_v20  ;;  %883 = vset.pattern.permute.xlu1 %v981_v23 }
  0x49   : > { %815 = vmatprep.subr.mxu1 %v478_v21  ;;  %614 = vperm.xlu0 %882, %v742_v22  }
  0x4a   : > { %816 = vmatpush3.msra.mxu1 %v478_v21  ;;  %622 = vperm.xlu1 %883, %v744_v24  }
  0x4d   : > { %618 = vperm.xlu0 %882, %v743_v25  }
  0xc4   : > { %v615_v32 = vpop.permute.xlu0 %614 }
  0xc5   : > { %v623_v42 = vpop.permute.xlu1 %622 }
  0xc8   : > { %v619_v36 = vpop.permute.xlu0 %618 }
  0xfe   : > { %v786_v26 = vpop.f32.mrf.mxu0 }
 0x100   : > { %v307_v27 = vpop.f32.mrf.mxu0 }
 0x101   : > { %v797_v28 = vpop.f32.mrf.mxu1  ;;  %817 = vmatprep.mubr.msk.f32.mxu1 %vm234_vm0, %v307_v27 }
 0x102   : > { %818 = vmatmul.mubr.msk.f32.vlgmr.msra.gmra.mxu1 %vm234_vm0, %v786_v26 }
 0x103   : > { %v388_v29 = vpop.f32.mrf.mxu1 }
 0x104   : > { %820 = vmatprep.mubr.msk.f32.mxu1 %vm234_vm0, %v388_v29 }
 0x106   : > { %821 = vmatmul.mubr.msk.f32.gmra.mxu1 %vm234_vm0, %v797_v28 }
 0x107   : > { %v808_v30 = vpop.f32.mrf.mxu0 }
 0x109   : > { %v469_v31 = vpop.f32.mrf.mxu0 }
 0x10a   : > { %823 = vmatprep.mubr.msk.f32.mxu1 %vm234_vm0, %v469_v31 }
 0x10b   : > { %824 = vmatmul.mubr.msk.f32.gmra.mxu1 %vm234_vm0, %v808_v30 }
 0x1c2   : > { %v819_v33 = vpop.f32.mrf.mxu1 }
 0x1c3   : > { %v626_v34 = vadd.f32 %v819_v33, %v615_v32 }
 0x1c4   : > { %v566_v35 = vpop.f32.mrf.mxu1 }
 0x1c5   : > { %633 = vst.msk [vmem:[%s215_s6 + $0x8] sm:$0xff] %vm631_vm1, %v626_v34  ;;  %v625_v37 = vadd.f32 %v615_v32, %v566_v35 }
 0x1c6   : > { %v822_v38 = vpop.f32.mrf.mxu1 }
 0x1c7   : > { %632 = vst.msk [vmem:[%s215_s6] sm:$0xff] %vm631_vm1, %v625_v37  ;;  %v628_v39 = vadd.f32 %v822_v38, %v619_v36 }
 0x1c8   : > { %v576_v40 = vpop.f32.mrf.mxu1 }
 0x1c9   : > { %635 = vst.msk [vmem:[%s215_s6 + $0x18] sm:$0xff] %vm631_vm1, %v628_v39  ;;  %v627_v41 = vadd.f32 %v619_v36, %v576_v40 }
 0x1cb   : > { %634 = vst.msk [vmem:[%s215_s6 + $0x10] sm:$0xff] %vm631_vm1, %v627_v41  ;;  %v825_v43 = vpop.f32.mrf.mxu1 }
 0x1cc   : > { %v630_v44 = vadd.f32 %v825_v43, %v623_v42 }
 0x1cd   : > { %v586_v45 = vpop.f32.mrf.mxu1 }
 0x1ce   : > { %637 = vst.msk [vmem:[%s215_s6 + $0x28] sm:$0xff] %vm631_vm1, %v630_v44  ;;  %v629_v46 = vadd.f32 %v623_v42, %v586_v45 }
 0x1d0   : > { %636 = vst.msk [vmem:[%s215_s6 + $0x20] sm:$0xff] %vm631_vm1, %v629_v46 }
 0x1d1   : > { %925 = shalt.err (!%p922_p10)
}
 0x1d2   : > { %s926_s22 = scalar_lea.hbm %s1185_s7, 768  ;;  %s930_s29 = scalar_lea.hbm %s1234_s4, 1536 }
 0x1d3   : > { %p927_p0 = scmp.ne.s32.totalorder %s1185_s7, %s926_s22  ;;  %p931_p1 = scmp.lt.s32.totalorder %s1185_s7, %s1234_s4 }
 0x1d4   : > { %p932_p3 = scmp.lt.s32.totalorder %s930_s29, %s926_s22 }
 0x1d5   : > { %p928_p2 = pnand %p927_p0, %p1242_p12 }
 0x1d6   : > { %p933_p6 = por %p932_p3, %p931_p1 }
 0x1d7   : > { %p929_p9 = pneg %p928_p2 }
 0x1d9   : > { %p934_p11 = pnand %p933_p6, %p929_p9 }
 0x1db   : > { %937 = shalt.err (!%p934_p11)
}
 0x1dc   : > { %s983_s6 = smov 128   ;;  %s984_s13 = smov 8  }
 0x1dd   : > { %833 = dma.vmem_to_hbm [thread:$0]  (%p1242_p12), %s1180_s9, 768, %s1185_s7, %s639_s19, %s983_s6, %s983_s6, %s984_s13  }
 0x1de PF: > { %s667_s14 = sand.u32 1, %s964_s15   ;;  %p1243_p13 = scmp.ne.s32.totalorder %s1239_s27, 0 }
 0x1df   : > { %p1244_p4 = scmp.ge.s32.totalorder %s976_s18, 2  ;;  %s668_s25 = scalar_lea.sflag [#allocation4], %s667_s14 }
 0x1e1   : > { %p840_p5 = pnand %p1244_p4, %p1243_p13 }
 0x1e3   : > { %p841_p7 = pneg %p840_p5 }
 0x1e5   : > { %959 = dma.done.wait (%p841_p7), %s668_s25, 768  }
 0x1e6   : > { %961 = vsyncadd (%p841_p7), %s668_s25, 4294966528  ;;  %p17_p8 = scmp.ge.s32.totalorder %s1035_s21, 4   ;;  %s1245_s15 = smov %s968_s16 }
 0x1e7   : > { %s1246_s16 = smov %s972_s17  ;;  %s1247_s17 = smov %s1047_s24 }
 0x1e8   : > { %s1248_s18 = smov %s1035_s21  ;;  %19 = sbr.rel (!%p17_p8) target bundleno = 5 (0x5), region = 81 }
 0x1ed   :  { %673 = vsyncpa [#allocation3], 1 }
 0x1ee   :  { %675 = vsyncpa [#allocation3 + $0x1], 1 }
 0x1ef   :  { %676 = vsyncpa [#allocation4], 1 }
 0x1f0   :  { %678 = vsyncpa [#allocation4 + $0x1], 1 }

</bundles_post_ra>
